<compile_context>
chip_gen: v7x
topology: tpu7x:2x2x1
jax: 0.10.0
libtpu: 0.0.40
codegen_flags: <defaults>
</compile_context>

<pallas_src>
import math

import numpy as np
import jax
import jax.numpy as jnp
from jax.experimental import pallas as pl
from jax.experimental.pallas import tpu as pltpu


def _round_up(x, m):
    return (x + m - 1) // m * m


# ----------------------- Stage 1: hw = (h @ W) * norm -----------------------

def _project_kernel(h_ref, w_ref, norm_ref, o_ref, acc_ref):
    k = pl.program_id(2)

    @pl.when(k == 0)
    def _():
        acc_ref[...] = jnp.zeros_like(acc_ref)

    acc_ref[...] += jnp.dot(h_ref[...], w_ref[...],
                            preferred_element_type=jnp.float32)

    @pl.when(k == pl.num_programs(2) - 1)
    def _():
        o_ref[...] = (acc_ref[...] * norm_ref[...]).astype(o_ref.dtype)


def _project(h_bf16, w_bf16, norm_f32, *, tm, tn, tk, out_dtype):
    N, K = h_bf16.shape
    F = w_bf16.shape[1]
    grid = (N // tm, F // tn, K // tk)
    flops = 2 * N * K * F
    bytes_accessed = 2 * (N * K + K * F) + 4 * N + jnp.dtype(out_dtype).itemsize * N * F
    return pl.pallas_call(
        _project_kernel,
        out_shape=jax.ShapeDtypeStruct((N, F), out_dtype),
        grid_spec=pltpu.PrefetchScalarGridSpec(
            num_scalar_prefetch=0,
            grid=grid,
            in_specs=[
                pl.BlockSpec((tm, tk), lambda i, j, k: (i, k)),
                pl.BlockSpec((tk, tn), lambda i, j, k: (k, j)),
                pl.BlockSpec((tm, 1), lambda i, j, k: (i, 0)),
            ],
            out_specs=pl.BlockSpec((tm, tn), lambda i, j, k: (i, j)),
            scratch_shapes=[pltpu.VMEM((tm, tn), jnp.float32)],
        ),
        compiler_params=pltpu.CompilerParams(
            dimension_semantics=("parallel", "parallel", "arbitrary"),
            vmem_limit_bytes=32 << 20),
        cost_estimate=pl.CostEstimate(flops=flops, transcendentals=0,
                                      bytes_accessed=int(bytes_accessed)),
    )(h_bf16, w_bf16, norm_f32)


# ---------------- Stage 2: out = relu((A @ hw) * norm + bias) ----------------
# Flat nonzero-block list (grouped-matmul pattern): one grid step per nonzero
# (row-block, col-block) tile of the adjacency; feature axis not tiled.

def _agg_kernel(rows_ref, cols_ref, first_ref, last_ref,
                adj_ref, hw_ref, norm_ref, b_ref, o_ref, acc_ref):
    b = pl.program_id(0)

    @pl.when(first_ref[b] == 1)
    def _():
        acc_ref[...] = jnp.zeros_like(acc_ref)

    acc_ref[...] += jnp.dot(adj_ref[...], hw_ref[...],
                            preferred_element_type=jnp.float32)

    @pl.when(last_ref[b] == 1)
    def _():
        out = acc_ref[...] * norm_ref[...] + b_ref[...]
        o_ref[...] = jnp.maximum(out, 0.0).astype(o_ref.dtype)


# ------------------------- Graph-static preparation --------------------------

def prepare_graph(adj, *, block=256):
    """Once per graph (host side): padded bf16 adjacency + flat nonzero-block
    table. Keeps O(N^2) host work and d2h syncs out of the per-call path."""
    adj_np = np.asarray(adj, dtype=np.float32)
    N = adj_np.shape[0]
    Np = _round_up(N, block)
    adj_pad = np.zeros((Np, Np), np.float32)
    adj_pad[:N, :N] = adj_np

    n_blk = Np // block
    occ = adj_pad.reshape(n_blk, block, n_blk, block).any(axis=(1, 3))
    rows, cols, first, last = [], [], [], []
    for r in range(n_blk):
        cs = np.nonzero(occ[r])[0]
        if cs.size == 0:
            cs = np.array([0])            # dummy zero block so row is finalized
        for t, c in enumerate(cs):
            rows.append(r)
            cols.append(int(c))
            first.append(1 if t == 0 else 0)
            last.append(1 if t == cs.size - 1 else 0)

    return dict(
        N=N, Np=Np, block=block, n_blocks=len(rows),
        adj=jnp.asarray(adj_pad, dtype=jnp.bfloat16),   # 0/1 entries exact in bf16
        rows=jnp.asarray(np.asarray(rows, np.int32)),
        cols=jnp.asarray(np.asarray(cols, np.int32)),
        first=jnp.asarray(np.asarray(first, np.int32)),
        last=jnp.asarray(np.asarray(last, np.int32)),
    )


# ------------------------------- Full layer ----------------------------------

def gcn_layer(h, weight, norm, bias, graph, *, tile_n=256, tile_k=512):
    """GCNLayer forward (eval mode). `graph` comes from prepare_graph()."""
    # TODO(synk): dropout is identity in eval mode; training-mode dropout would
    # need pltpu.prng_seed/prng_random_bits and a keep-mask in stage 1.
    # TODO(synk): the module's `activation` is an arbitrary callable; ReLU used.
    N, in_feats = h.shape
    out_feats = weight.shape[1]
    Np, block = graph["Np"], graph["block"]
    assert graph["N"] == N

    # Lane-dense padded sizes; tiles chosen so they divide the padded dims.
    Kp = _round_up(in_feats, 128)
    tk = Kp if Kp <= tile_k else tile_k
    Kp = _round_up(Kp, tk)
    Fp = _round_up(out_feats, 128)
    tn = Fp if Fp <= tile_n else tile_n
    Fp = _round_up(Fp, tn)
    tm = block                               # same node-axis block everywhere

    # Stage-1 inputs in bf16 (MXU fast path); f32 accumulation inside kernel.
    h_p = jnp.zeros((Np, Kp), jnp.bfloat16).at[:N, :in_feats].set(
        h.astype(jnp.bfloat16))
    w_p = jnp.zeros((Kp, Fp), jnp.bfloat16).at[:in_feats, :out_feats].set(
        weight.astype(jnp.bfloat16))
    b_p = jnp.zeros((1, Fp), jnp.float32).at[0, :out_feats].set(
        jnp.reshape(bias, (out_feats,)))
    norm_p = jnp.zeros((Np, 1), jnp.float32).at[:N].set(norm)

    # Stage 1: hw = (h @ W) * norm, stored bf16 for the stage-2 bf16 MXU path.
    hw = _project(h_p, w_p, norm_p, tm=tm, tn=tn, tk=tk, out_dtype=jnp.bfloat16)

    adj = graph["adj"]
    n_blocks = graph["n_blocks"]
    n_row_tiles = Np // block

    flops = 2 * n_blocks * block * block * Fp
    bytes_accessed = (n_blocks * (block * block * 2 + block * Fp * 2)
                      + n_row_tiles * block * (Fp * 4 + 4) + Fp * 4)

    out_p = pl.pallas_call(
        _agg_kernel,
        out_shape=jax.ShapeDtypeStruct((Np, Fp), jnp.float32),
        grid_spec=pltpu.PrefetchScalarGridSpec(
            num_scalar_prefetch=4,
            grid=(n_blocks,),
            in_specs=[
                # adjacency (row block, sparse neighbor block)
                pl.BlockSpec((block, block),
                             lambda b, rows, cols, first, last: (rows[b], cols[b])),
                # matching hw neighbor block, full feature width
                pl.BlockSpec((block, Fp),
                             lambda b, rows, cols, first, last: (cols[b], 0)),
                pl.BlockSpec((block, 1),
                             lambda b, rows, cols, first, last: (rows[b], 0)),
                pl.BlockSpec((1, Fp),
                             lambda b, rows, cols, first, last: (0, 0)),
            ],
            out_specs=pl.BlockSpec((block, Fp),
                                   lambda b, rows, cols, first, last: (rows[b], 0)),
            scratch_shapes=[pltpu.VMEM((block, Fp), jnp.float32)],
        ),
        compiler_params=pltpu.CompilerParams(
            dimension_semantics=("arbitrary",),
            vmem_limit_bytes=32 << 20),
        cost_estimate=pl.CostEstimate(flops=flops, transcendentals=0,
                                      bytes_accessed=int(bytes_accessed)),
    )(graph["rows"], graph["cols"], graph["first"], graph["last"],
      adj, hw, norm_p, b_p)

    return out_p[:N, :out_feats]


def reference(h, weight, adj, norm, bias):
    hw = (h @ weight) * norm
    agg = adj @ hw
    return jnp.maximum(agg * norm + bias.reshape(1, -1), 0.0)


if __name__ == "__main__":
    N, in_feats, out_feats = 256, 64, 96

    key = jax.random.PRNGKey(0)
    k_h, k_w, k_b = jax.random.split(key, 3)

    # Node features.
    h = jax.random.normal(k_h, (N, in_feats), dtype=jnp.float32)

    # Deterministic parameter init matching reset_parameters():
    # uniform(-stdv, stdv) with stdv = 1/sqrt(out_feats).
    stdv = 1.0 / math.sqrt(out_feats)
    weight = jax.random.uniform(k_w, (in_feats, out_feats),
                                minval=-stdv, maxval=stdv, dtype=jnp.float32)
    bias = jax.random.uniform(k_b, (out_feats,),
                              minval=-stdv, maxval=stdv, dtype=jnp.float32)

    # Deterministic synthetic graph (host/numpy): ring with self-loops.
    idx = np.arange(N)
    adj_np = np.eye(N, dtype=np.float32)
    adj_np[idx, (idx + 1) % N] = 1.0
    adj_np[idx, (idx - 1) % N] = 1.0
    deg = adj_np.sum(axis=1, keepdims=True)
    norm = jnp.asarray(1.0 / np.sqrt(deg), dtype=jnp.float32)   # [N, 1]

    # Graph-static tables built once, outside the forward hot path.
    graph = prepare_graph(adj_np, block=256)

    out = gcn_layer(h, weight, norm, bias, graph)
    out = jax.block_until_ready(out)

    ref = reference(h, weight, jnp.asarray(adj_np), norm, bias)
    assert out.shape == (N, out_feats)
    # bf16 h/W/hw/adj on the MXU fast path -> slightly loosened tolerance.
    assert jnp.allclose(out, ref, atol=5e-2, rtol=5e-2), "mismatch vs reference"

    print("KERNEL_OK")
</pallas_src>

<mosaic_0001>
module attributes {stable_mosaic.version = 11 : i64} {
  func.func @_project_kernel(%arg0: i32, %arg1: i32, %arg2: i32, %arg3: memref<256x128xbf16, #tpu.memory_space<vmem>>, %arg4: memref<128x128xbf16, #tpu.memory_space<vmem>>, %arg5: memref<256x1xf32, #tpu.memory_space<vmem>>, %arg6: memref<256x128xbf16, #tpu.memory_space<vmem>>, %arg7: memref<256x128xf32, #tpu.memory_space<vmem>>) attributes {dimension_semantics = [#tpu.dimension_semantics<parallel>, #tpu.dimension_semantics<parallel>, #tpu.dimension_semantics<arbitrary>], iteration_bounds = array<i64: 1, 1, 1>, scalar_prefetch = 0 : i64, scratch_operands = 1 : i64, tpu.core_type = #tpu.core_type<tc>, window_params = [{transform_indices = @transform_0, window_bounds = array<i64: 256, 128>}, {transform_indices = @transform_1, window_bounds = array<i64: 128, 128>}, {transform_indices = @transform_2, window_bounds = array<i64: 256, 1>}, {transform_indices = @transform_3, window_bounds = array<i64: 256, 128>}]} {
    %c0_i32 = arith.constant 0 : i32
    %0 = arith.cmpi eq, %arg2, %c0_i32 : i32
    %1 = arith.extui %0 : i1 to i32
    %c0_i32_0 = arith.constant 0 : i32
    %2 = arith.cmpi ne, %1, %c0_i32_0 : i32
    scf.if %2 {
      %cst_10 = arith.constant 0.000000e+00 : f32
      %12 = vector.broadcast %cst_10 : f32 to vector<256x128xf32>
      %c0_11 = arith.constant 0 : index
      %c0_12 = arith.constant 0 : index
      %13 = vector.load %arg7[%c0_11, %c0_12] : memref<256x128xf32, #tpu.memory_space<vmem>>, vector<256x128xf32>
      tpu.vector_store %arg7[%c0_11, %c0_12], %12 {strides = array<i32>} : memref<256x128xf32, #tpu.memory_space<vmem>>, vector<256x128xf32>,
    } else {
    }
    %c0 = arith.constant 0 : index
    %c0_1 = arith.constant 0 : index
    %3 = vector.load %arg7[%c0, %c0_1] : memref<256x128xf32, #tpu.memory_space<vmem>>, vector<256x128xf32>
    %c0_2 = arith.constant 0 : index
    %c0_3 = arith.constant 0 : index
    %4 = vector.load %arg3[%c0_2, %c0_3] : memref<256x128xbf16, #tpu.memory_space<vmem>>, vector<256x128xbf16>
    %c0_4 = arith.constant 0 : index
    %c0_5 = arith.constant 0 : index
    %5 = vector.load %arg4[%c0_4, %c0_5] : memref<128x128xbf16, #tpu.memory_space<vmem>>, vector<128x128xbf16>
    %cst = arith.constant dense<0.000000e+00> : vector<256x128xf32>
    %6 = tpu.matmul %4, %5, %cst {dimension_numbers = #tpu.dot_dimension_numbers<[1], [0], [0], [1], [0, 0, 1, 1], [], []>} : vector<256x128xbf16>, vector<128x128xbf16>, vector<256x128xf32> -> vector<256x128xf32>
    %7 = arith.addf %3, %6 : vector<256x128xf32>
    %c0_6 = arith.constant 0 : index
    %c0_7 = arith.constant 0 : index
    %8 = vector.load %arg7[%c0_6, %c0_7] : memref<256x128xf32, #tpu.memory_space<vmem>>, vector<256x128xf32>
    tpu.vector_store %arg7[%c0_6, %c0_7], %7 {strides = array<i32>} : memref<256x128xf32, #tpu.memory_space<vmem>>, vector<256x128xf32>,
    %c0_i32_8 = arith.constant 0 : i32
    %9 = arith.cmpi eq, %arg2, %c0_i32_8 : i32
    %10 = arith.extui %9 : i1 to i32
    %c0_i32_9 = arith.constant 0 : i32
    %11 = arith.cmpi ne, %10, %c0_i32_9 : i32
    scf.if %11 {
      %c0_10 = arith.constant 0 : index
      %c0_11 = arith.constant 0 : index
      %12 = vector.load %arg7[%c0_10, %c0_11] : memref<256x128xf32, #tpu.memory_space<vmem>>, vector<256x128xf32>
      %c0_12 = arith.constant 0 : index
      %c0_13 = arith.constant 0 : index
      %13 = vector.load %arg5[%c0_12, %c0_13] : memref<256x1xf32, #tpu.memory_space<vmem>>, vector<256x1xf32>
      %14 = vector.broadcast %13 : vector<256x1xf32> to vector<256x128xf32>
      %15 = arith.mulf %12, %14 : vector<256x128xf32>
      %16 = arith.truncf %15 : vector<256x128xf32> to vector<256x128xbf16>
      %c0_14 = arith.constant 0 : index
      %c0_15 = arith.constant 0 : index
      %17 = vector.load %arg6[%c0_14, %c0_15] : memref<256x128xbf16, #tpu.memory_space<vmem>>, vector<256x128xbf16>
      tpu.vector_store %arg6[%c0_14, %c0_15], %16 {strides = array<i32>} : memref<256x128xbf16, #tpu.memory_space<vmem>>, vector<256x128xbf16>,
    } else {
    }
    return
  }
  func.func @transform_0(%arg0: i32, %arg1: i32, %arg2: i32) -> (i32, i32) {
    %c0_i32 = arith.constant 0 : i32
    return %arg0, %arg2 : i32, i32
  }
  func.func @transform_1(%arg0: i32, %arg1: i32, %arg2: i32) -> (i32, i32) {
    %c0_i32 = arith.constant 0 : i32
    return %arg2, %arg1 : i32, i32
  }
  func.func @transform_2(%arg0: i32, %arg1: i32, %arg2: i32) -> (i32, i32) {
    %c0_i32 = arith.constant 0 : i32
    %c0_i32_0 = arith.constant 0 : i32
    return %arg0, %c0_i32 : i32, i32
  }
  func.func @transform_3(%arg0: i32, %arg1: i32, %arg2: i32) -> (i32, i32) {
    %c0_i32 = arith.constant 0 : i32
    return %arg0, %arg1 : i32, i32
  }
}

</mosaic_0001>

<bundles_post_ra>
// kernel: tpu_custom_call.1
= control target key start
LH: loop header
LB: loop body
LE: loop exit
PB: predicated region body
PF: predicated region fallthrough
CT: control target
= control target key end

     0   :  { %v1261_v2 = vmov 0   ;;  %s1495_s0 = inlined_call_operand.vmem [shape: bf16[256,128], index: 0, kind: input, shape index: {}]   ;;  %s1496_s1 = inlined_call_operand.vmem [shape: bf16[128,128], index: 1, kind: input, shape index: {}]   ;;  %s1497_s2 = inlined_call_operand.vmem [shape: f32[256,1], index: 2, kind: input, shape index: {}]   ;;  %s1498_s3 = inlined_call_operand.hbm [shape: bf16[256,128], index: 3, kind: output, shape index: {}]  }
   0x1   :  { %v1213_v0 = vld [vmem:[%s1496_s1] sm:$0xff]   ;;  %v1214_v1 = vld [vmem:[%s1496_s1 + $0x8] sm:$0xff]   ;;  %1212 = vset.pattern.permute.xlu1 %v1261_v2  ;;  %1211 = vset.pattern.permute.xlu0 %v1261_v2  ;;  %v1215_v3 = vld [vmem:[%s1496_s1 + $0x10] sm:$0xff]  }
   0x2   :  { %1143 = vmatprep.subr.bf16.mxu0 %v1213_v0  ;;  %1191 = vmatprep.subr.bf16.mxu1 %v1213_v0  ;;  %v538_v4 = vld [vmem:[%s1497_s2 + $0x10] sm:$0xff]  ;;  %v536_v5 = vld [vmem:[%s1497_s2] sm:$0xff]  ;;  %v1216_v6 = vld [vmem:[%s1496_s1 + $0x18] sm:$0xff]  }
   0x3   :  { %1144 = vmatpush3.bf16.msra.mxu0 %v1213_v0  ;;  %1199 = vmatpush3.bf16.msra.mxu1 %v1213_v0  ;;  %v539_v7 = vld [vmem:[%s1497_s2 + $0x18] sm:$0xff]  ;;  %v537_v8 = vld [vmem:[%s1497_s2 + $0x8] sm:$0xff]  ;;  %v1221_v9 = vld [vmem:[%s1495_s0] sm:$0xff]  }
   0x4   :  { %1145 = vmatprep.subr.bf16.mxu0 %v1214_v1  ;;  %1192 = vmatprep.subr.bf16.mxu1 %v1214_v1  ;;  %v1222_v10 = vld [vmem:[%s1495_s0 + $0x40] sm:$0xff]   ;;  %v541_v12 = vld [vmem:[%s1497_s2 + $0x28] sm:$0xff]  ;;  %v543_v15 = vld [vmem:[%s1497_s2 + $0x38] sm:$0xff] }
   0x5   :  { %580 = vperm.xlu1 %1212, %v538_v4   ;;  %570 = vperm.xlu0 %1211, %v536_v5   ;;  %v1217_v11 = vld [vmem:[%s1496_s1 + $0x20] sm:$0xff]   ;;  %v1218_v14 = vld [vmem:[%s1496_s1 + $0x28] sm:$0xff]   ;;  %v542_v16 = vld [vmem:[%s1497_s2 + $0x30] sm:$0xff] }
   0x6   :  { %v540_v13 = vld [vmem:[%s1497_s2 + $0x20] sm:$0xff]  ;;  %1159 = vmatprep.mubr.bf16.mxu0 %v1221_v9  ;;  %1175 = vmatprep.mubr.bf16.mxu1 %v1222_v10  ;;  %v1219_v17 = vld [vmem:[%s1496_s1 + $0x30] sm:$0xff]   ;;  %v545_v18 = vld [vmem:[%s1497_s2 + $0x48] sm:$0xff] }
   0x7   :  { %1146 = vmatpush3.bf16.msra.mxu0 %v1214_v1  ;;  %1200 = vmatpush3.bf16.msra.mxu1 %v1214_v1  ;;  %v544_v19 = vld [vmem:[%s1497_s2 + $0x40] sm:$0xff]  ;;  %v1220_v20 = vld [vmem:[%s1496_s1 + $0x38] sm:$0xff]   ;;  %v546_v22 = vld [vmem:[%s1497_s2 + $0x50] sm:$0xff] }
   0x8   :  { %1147 = vmatprep.subr.bf16.mxu0 %v1215_v3  ;;  %1193 = vmatprep.subr.bf16.mxu1 %v1215_v3  ;;  %v547_v21 = vld [vmem:[%s1497_s2 + $0x58] sm:$0xff]  ;;  %v1223_v23 = vld [vmem:[%s1495_s0 + $0x8] sm:$0xff]   ;;  %v548_v26 = vld [vmem:[%s1497_s2 + $0x60] sm:$0xff] }
   0x9   :  { %585 = vperm.xlu1 %1212, %v539_v7   ;;  %575 = vperm.xlu0 %1211, %v537_v8   ;;  %v1224_v24 = vld [vmem:[%s1495_s0 + $0x48] sm:$0xff]   ;;  %v1225_v27 = vld [vmem:[%s1495_s0 + $0x10] sm:$0xff]   ;;  %v551_v29 = vld [vmem:[%s1497_s2 + $0x78] sm:$0xff] }
   0xa   :  { %v549_v25 = vld [vmem:[%s1497_s2 + $0x68] sm:$0xff]  ;;  %v1226_v28 = vld [vmem:[%s1495_s0 + $0x50] sm:$0xff]  }
   0xb   :  { %1148 = vmatpush3.bf16.msra.mxu0 %v1215_v3  ;;  %1201 = vmatpush3.bf16.msra.mxu1 %v1215_v3  ;;  %v550_v30 = vld [vmem:[%s1497_s2 + $0x70] sm:$0xff] }
   0xc   :  { %1149 = vmatprep.subr.bf16.mxu0 %v1216_v6  ;;  %1194 = vmatprep.subr.bf16.mxu1 %v1216_v6 }
   0xd   :  { %595 = vperm.xlu1 %1212, %v541_v12   ;;  %590 = vperm.xlu0 %1211, %v540_v13  }
   0xf   :  { %1150 = vmatpush3.bf16.msra.mxu0 %v1216_v6  ;;  %1202 = vmatpush3.bf16.msra.mxu1 %v1216_v6 }
  0x10   :  { %1151 = vmatprep.subr.bf16.mxu0 %v1217_v11  ;;  %1195 = vmatprep.subr.bf16.mxu1 %v1217_v11 }
  0x11   :  { %605 = vperm.xlu1 %1212, %v543_v15   ;;  %600 = vperm.xlu0 %1211, %v542_v16  }
  0x13   :  { %1152 = vmatpush3.bf16.msra.mxu0 %v1217_v11  ;;  %1203 = vmatpush3.bf16.msra.mxu1 %v1217_v11 }
  0x14   :  { %1153 = vmatprep.subr.bf16.mxu0 %v1218_v14  ;;  %1196 = vmatprep.subr.bf16.mxu1 %v1218_v14 }
  0x15   :  { %615 = vperm.xlu1 %1212, %v545_v18   ;;  %610 = vperm.xlu0 %1211, %v544_v19  }
  0x17   :  { %1154 = vmatpush3.bf16.msra.mxu0 %v1218_v14  ;;  %1204 = vmatpush3.bf16.msra.mxu1 %v1218_v14 }
  0x18   :  { %1155 = vmatprep.subr.bf16.mxu0 %v1219_v17  ;;  %1197 = vmatprep.subr.bf16.mxu1 %v1219_v17 }
  0x19   :  { %625 = vperm.xlu1 %1212, %v547_v21   ;;  %620 = vperm.xlu0 %1211, %v546_v22  }
  0x1b   :  { %1156 = vmatpush3.bf16.msra.mxu0 %v1219_v17  ;;  %1205 = vmatpush3.bf16.msra.mxu1 %v1219_v17 }
  0x1c   :  { %1157 = vmatprep.subr.bf16.mxu0 %v1220_v20  ;;  %1198 = vmatprep.subr.bf16.mxu1 %v1220_v20 }
  0x1d   :  { %635 = vperm.xlu1 %1212, %v549_v25   ;;  %630 = vperm.xlu0 %1211, %v548_v26  }
  0x1f   :  { %1158 = vmatpush3.bf16.msra.mxu0 %v1220_v20  ;;  %1206 = vmatpush3.bf16.msra.mxu1 %v1220_v20 }
  0x22   :  { %1160 = vmatmul.mubr.bf16.vlgmr.msra.gmra.mrb[0].mxu0 %v1223_v23  ;;  %1176 = vmatmul.mubr.bf16.vlgmr.msra.gmra.mrb[0].mxu1 %v1224_v24 }
  0x23   :  { %8 = vsyncpa [#allocation4], 0  ;;  %1163 = vmatprep.mubr.bf16.mxu0 %v1225_v27  ;;  %1179 = vmatprep.mubr.bf16.mxu1 %v1226_v28  ;;  %v1227_v31 = vld [vmem:[%s1495_s0 + $0x18] sm:$0xff]   ;;  %v553_v33 = vld [vmem:[%s1497_s2 + $0x88] sm:$0xff] }
  0x24   :  { %645 = vperm.xlu1 %1212, %v551_v29   ;;  %640 = vperm.xlu0 %1211, %v550_v30   ;;  %v1228_v32 = vld [vmem:[%s1495_s0 + $0x58] sm:$0xff]   ;;  %v552_v34 = vld [vmem:[%s1497_s2 + $0x80] sm:$0xff]  ;;  %v554_v38 = vld [vmem:[%s1497_s2 + $0x90] sm:$0xff] }
  0x25   :  { %v1229_v35 = vld [vmem:[%s1495_s0 + $0x20] sm:$0xff]   ;;  %v555_v37 = vld [vmem:[%s1497_s2 + $0x98] sm:$0xff]  ;;  %v1231_v39 = vld [vmem:[%s1495_s0 + $0x28] sm:$0xff]  }
  0x26   :  { %v1230_v36 = vld [vmem:[%s1495_s0 + $0x60] sm:$0xff]   ;;  %v1232_v40 = vld [vmem:[%s1495_s0 + $0x68] sm:$0xff]   ;;  %v1233_v43 = vld [vmem:[%s1495_s0 + $0x30] sm:$0xff]  }
  0x27   :  { %v557_v41 = vld [vmem:[%s1497_s2 + $0xa8] sm:$0xff]  ;;  %v556_v42 = vld [vmem:[%s1497_s2 + $0xa0] sm:$0xff]  ;;  %v1234_v44 = vld [vmem:[%s1495_s0 + $0x70] sm:$0xff]  }
  0x28   :  { %655 = vperm.xlu1 %1212, %v553_v33   ;;  %650 = vperm.xlu0 %1211, %v552_v34   ;;  %v559_v45 = vld [vmem:[%s1497_s2 + $0xb8] sm:$0xff]  ;;  %v558_v46 = vld [vmem:[%s1497_s2 + $0xb0] sm:$0xff]  ;;  %v561_v49 = vld [vmem:[%s1497_s2 + $0xc8] sm:$0xff] }
  0x29   :  { %v1235_v47 = vld [vmem:[%s1495_s0 + $0x38] sm:$0xff]   ;;  %v560_v50 = vld [vmem:[%s1497_s2 + $0xc0] sm:$0xff]  ;;  %v562_v52 = vld [vmem:[%s1497_s2 + $0xd0] sm:$0xff] }
  0x2a   :  { %1164 = vmatmul.mubr.bf16.gmra.mrb[4].mxu0 %v1227_v31  ;;  %1180 = vmatmul.mubr.bf16.gmra.mrb[4].mxu1 %v1228_v32  ;;  %v1236_v48 = vld [vmem:[%s1495_s0 + $0x78] sm:$0xff]   ;;  %v565_v53 = vld [vmem:[%s1497_s2 + $0xe8] sm:$0xff]  ;;  %v564_v54 = vld [vmem:[%s1497_s2 + $0xe0] sm:$0xff] }
  0x2b   :  { %1167 = vmatprep.mubr.bf16.mxu0 %v1229_v35  ;;  %1183 = vmatprep.mubr.bf16.mxu1 %v1230_v36  ;;  %v563_v51 = vld [vmem:[%s1497_s2 + $0xd8] sm:$0xff]  ;;  %v566_v56 = vld [vmem:[%s1497_s2 + $0xf0] sm:$0xff] }
  0x2c   :  { %665 = vperm.xlu1 %1212, %v555_v37   ;;  %660 = vperm.xlu0 %1211, %v554_v38   ;;  %v567_v55 = vld [vmem:[%s1497_s2 + $0xf8] sm:$0xff]  ;;  %s1262_s2 = smov [#allocation3]  }
  0x2d   :  { %s925_s12 = sshll.u32 %s1262_s2, 4  ;;  %s926_s12 = int_to_ptr.vmem [resolvable:$true] %s925_s12 }
  0x2e   :  { %s1237_s13 = scalar_lea.vmem %s926_s12, 2048  ;;  %p1242_p1 = scmp.lt.s32.totalorder %s926_s12, %s926_s12 }
  0x2f   :  { %p1238_p0 = scmp.ne.s32.totalorder %s926_s12, %s1237_s13  ;;  %p1243_p2 = scmp.lt.s32.totalorder %s1237_s13, %s1237_s13 }
  0x30   :  { %675 = vperm.xlu1 %1212, %v557_v41   ;;  %670 = vperm.xlu0 %1211, %v556_v42  }
  0x31   :  { %p1244_p3 = por %p1243_p2, %p1242_p1 }
  0x32   :  { %1168 = vmatmul.mubr.bf16.gmra.mrb[8].mxu0 %v1231_v39  ;;  %1184 = vmatmul.mubr.bf16.gmra.mrb[8].mxu1 %v1232_v40 }
  0x33   :  { %1171 = vmatprep.mubr.bf16.mxu0 %v1233_v43  ;;  %1187 = vmatprep.mubr.bf16.mxu1 %v1234_v44  ;;  %p1245_p4 = pnand %p1244_p3, %p1238_p0 }
  0x34   :  { %685 = vperm.xlu1 %1212, %v559_v45   ;;  %680 = vperm.xlu0 %1211, %v558_v46  }
  0x38   :  { %695 = vperm.xlu1 %1212, %v561_v49   ;;  %690 = vperm.xlu0 %1211, %v560_v50  }
  0x3a   :  { %1172 = vmatmul.mubr.bf16.gmra.mrb[12].mxu0 %v1235_v47  ;;  %1188 = vmatmul.mubr.bf16.gmra.mrb[12].mxu1 %v1236_v48 }
  0x3c   :  { %705 = vperm.xlu1 %1212, %v563_v51   ;;  %700 = vperm.xlu0 %1211, %v562_v52  }
  0x40   :  { %715 = vperm.xlu1 %1212, %v565_v53   ;;  %710 = vperm.xlu0 %1211, %v564_v54  }
  0x44   :  { %725 = vperm.xlu1 %1212, %v567_v55   ;;  %720 = vperm.xlu0 %1211, %v566_v56  }
  0x84   :  { %v581_v57 = vpop.permute.xlu1 %580  ;;  %v571_v58 = vpop.permute.xlu0 %570 }
  0x88   :  { %v586_v59 = vpop.permute.xlu1 %585  ;;  %v576_v60 = vpop.permute.xlu0 %575 }
  0x8c   :  { %v596_v61 = vpop.permute.xlu1 %595  ;;  %v591_v62 = vpop.permute.xlu0 %590 }
  0x90   :  { %v606_v63 = vpop.permute.xlu1 %605  ;;  %v601_v0 = vpop.permute.xlu0 %600 }
  0x94   :  { %v1453_v1 = vpop.permute.xlu1 %615  ;;  %v1455_v2 = vpop.permute.xlu0 %610 }
  0x98   :  { %v1457_v3 = vpop.permute.xlu1 %625  ;;  %v1459_v4 = vpop.permute.xlu0 %620 }
  0x9c   :  { %v1461_v5 = vpop.permute.xlu1 %635  ;;  %v1463_v6 = vpop.permute.xlu0 %630 }
  0xa3   :  { %v1465_v7 = vpop.permute.xlu1 %645  ;;  %v1467_v8 = vpop.permute.xlu0 %640 }
  0xa7   :  { %v656_v9 = vpop.permute.xlu1 %655  ;;  %v651_v10 = vpop.permute.xlu0 %650 }
  0xab   :  { %v666_v11 = vpop.permute.xlu1 %665  ;;  %v661_v12 = vpop.permute.xlu0 %660 }
  0xaf   :  { %v676_v13 = vpop.permute.xlu1 %675  ;;  %v671_v14 = vpop.permute.xlu0 %670 }
  0xb3   :  { %v686_v15 = vpop.permute.xlu1 %685  ;;  %v681_v16 = vpop.permute.xlu0 %680 }
  0xb7   :  { %v1469_v17 = vpop.permute.xlu1 %695  ;;  %v1471_v18 = vpop.permute.xlu0 %690 }
  0xbb   :  { %v706_v39 = vpop.permute.xlu1 %705  ;;  %v701_v40 = vpop.permute.xlu0 %700 }
  0xf5   :  { %v1161_v19 = vpop.f32.mrb[0].mxu0  ;;  %v1177_v20 = vpop.f32.mrb[0].mxu1 }
  0xf6   :  { %v310_v21 = vpop.f32.mrb[1].mxu0  ;;  %v374_v22 = vpop.f32.mrb[1].mxu1  ;;  %v730_v25 = vmul.f32 %v1161_v19, %v581_v57  ;;  %v746_v26 = vmul.f32 %v1177_v20, %v661_v12 }
  0xf7   :  { %v1162_v23 = vpop.f32.mrb[2].mxu0  ;;  %v1178_v24 = vpop.f32.mrb[2].mxu1  ;;  %v728_v31 = vmul.f32 %v571_v58, %v310_v21  ;;  %v744_v32 = vmul.f32 %v651_v10, %v374_v22 }
  0xf8   :  { %v731_v27 = vmul.f32 %v1162_v23, %v586_v59  ;;  %v747_v28 = vmul.f32 %v1178_v24, %v666_v11  ;;  %v313_v29 = vpop.f32.mrb[3].mxu0  ;;  %v377_v30 = vpop.f32.mrb[3].mxu1 }
  0xf9   :  { %v729_v33 = vmul.f32 %v576_v60, %v313_v29  ;;  %v745_v34 = vmul.f32 %v656_v9, %v377_v30  ;;  %v716_v9 = vpop.permute.xlu1 %715  ;;  %v711_v10 = vpop.permute.xlu0 %710 }
  0xfa   :  { %v1032_v35 = vpack.c.bf16 %v731_v27, %v730_v25  ;;  %v1072_v36 = vpack.c.bf16 %v747_v28, %v746_v26 }
  0xfb   :  { %v1027_v37 = vpack.c.bf16 %v729_v33, %v728_v31  ;;  %v1067_v38 = vpack.c.bf16 %v745_v34, %v744_v32 }
  0xfc   :  { %1104 = vst [vmem:[#allocation3 + $0x8] sm:$0xff] %v1032_v35   ;;  %1112 = vst [vmem:[#allocation3 + $0x48] sm:$0xff] %v1072_v36  }
  0xfd   :  { %1028 = vst [vmem:[#allocation3] sm:$0xff] %v1027_v37   ;;  %1111 = vst [vmem:[#allocation3 + $0x40] sm:$0xff] %v1067_v38   ;;  %v1165_v41 = vpop.f32.mrb[4].mxu0  ;;  %v1181_v42 = vpop.f32.mrb[4].mxu1 }
  0xfe   :  { %v326_v43 = vpop.f32.mrb[5].mxu0  ;;  %v390_v44 = vpop.f32.mrb[5].mxu1  ;;  %v734_v47 = vmul.f32 %v1165_v41, %v601_v0  ;;  %v750_v48 = vmul.f32 %v1181_v42, %v681_v16 }
  0xff   :  { %v1166_v45 = vpop.f32.mrb[6].mxu0  ;;  %v1182_v46 = vpop.f32.mrb[6].mxu1  ;;  %v732_v53 = vmul.f32 %v591_v62, %v326_v43  ;;  %v748_v54 = vmul.f32 %v671_v14, %v390_v44 }
 0x100   :  { %v735_v49 = vmul.f32 %v1166_v45, %v606_v63  ;;  %v751_v50 = vmul.f32 %v1182_v46, %v686_v15  ;;  %v329_v51 = vpop.f32.mrb[7].mxu0  ;;  %v393_v52 = vpop.f32.mrb[7].mxu1 }
 0x101   :  { %v733_v55 = vmul.f32 %v596_v61, %v329_v51  ;;  %v749_v56 = vmul.f32 %v676_v13, %v393_v52  ;;  %v726_v29 = vpop.permute.xlu1 %725 }
 0x102   :  { %v1042_v57 = vpack.c.bf16 %v735_v49, %v734_v47  ;;  %v1082_v58 = vpack.c.bf16 %v751_v50, %v750_v48 }
 0x103   :  { %v1037_v59 = vpack.c.bf16 %v733_v55, %v732_v53  ;;  %v1077_v60 = vpack.c.bf16 %v749_v56, %v748_v54 }
 0x104   :  { %1106 = vst [vmem:[#allocation3 + $0x18] sm:$0xff] %v1042_v57   ;;  %1114 = vst [vmem:[#allocation3 + $0x58] sm:$0xff] %v1082_v58  }
 0x105   :  { %1105 = vst [vmem:[#allocation3 + $0x10] sm:$0xff] %v1037_v59   ;;  %1113 = vst [vmem:[#allocation3 + $0x50] sm:$0xff] %v1077_v60   ;;  %v1169_v0 = vpop.f32.mrb[8].mxu0  ;;  %v1185_v11 = vpop.f32.mrb[8].mxu1 }
 0x106   :  { %v342_v63 = vpop.f32.mrb[9].mxu0  ;;  %v406_v12 = vpop.f32.mrb[9].mxu1  ;;  %v738_v62 = vmul.f32 %v1169_v0, %v1459_v4  ;;  %v754_v61 = vmul.f32 %v1185_v11, %v701_v40 }
 0x107   :  { %v1170_v15 = vpop.f32.mrb[10].mxu0  ;;  %v1186_v16 = vpop.f32.mrb[10].mxu1  ;;  %v736_v21 = vmul.f32 %v1455_v2, %v342_v63  ;;  %v752_v22 = vmul.f32 %v1471_v18, %v406_v12 }
 0x108   :  { %v739_v13 = vmul.f32 %v1170_v15, %v1457_v3  ;;  %v755_v14 = vmul.f32 %v1186_v16, %v706_v39  ;;  %v345_v19 = vpop.f32.mrb[11].mxu0  ;;  %v409_v20 = vpop.f32.mrb[11].mxu1 }
 0x109   :  { %v737_v23 = vmul.f32 %v1453_v1, %v345_v19  ;;  %v753_v24 = vmul.f32 %v1469_v17, %v409_v20  ;;  %v721_v4 = vpop.permute.xlu0 %720 }
 0x10a   :  { %v1052_v25 = vpack.c.bf16 %v739_v13, %v738_v62  ;;  %v1092_v26 = vpack.c.bf16 %v755_v14, %v754_v61 }
 0x10b   :  { %v1047_v27 = vpack.c.bf16 %v737_v23, %v736_v21  ;;  %v1087_v28 = vpack.c.bf16 %v753_v24, %v752_v22 }
 0x10c   :  { %1108 = vst [vmem:[#allocation3 + $0x28] sm:$0xff] %v1052_v25   ;;  %1116 = vst [vmem:[#allocation3 + $0x68] sm:$0xff] %v1092_v26  }
 0x10d   :  { %1107 = vst [vmem:[#allocation3 + $0x20] sm:$0xff] %v1047_v27   ;;  %1115 = vst [vmem:[#allocation3 + $0x60] sm:$0xff] %v1087_v28   ;;  %v1173_v3 = vpop.f32.mrb[12].mxu0  ;;  %v1189_v30 = vpop.f32.mrb[12].mxu1 }
 0x10e   :  { %v358_v31 = vpop.f32.mrb[13].mxu0  ;;  %v422_v2 = vpop.f32.mrb[13].mxu1  ;;  %v742_v1 = vmul.f32 %v1173_v3, %v1467_v8  ;;  %v758_v17 = vmul.f32 %v1189_v30, %v721_v4 }
 0x10f   :  { %v1174_v32 = vpop.f32.mrb[14].mxu0  ;;  %v1190_v18 = vpop.f32.mrb[14].mxu1  ;;  %v740_v37 = vmul.f32 %v1463_v6, %v358_v31  ;;  %v756_v38 = vmul.f32 %v711_v10, %v422_v2 }
 0x110   :  { %v743_v33 = vmul.f32 %v1174_v32, %v1465_v7  ;;  %v759_v34 = vmul.f32 %v1190_v18, %v726_v29  ;;  %v361_v35 = vpop.f32.mrb[15].mxu0  ;;  %v425_v36 = vpop.f32.mrb[15].mxu1 }
 0x111   :  { %v741_v39 = vmul.f32 %v1461_v5, %v361_v35  ;;  %v757_v40 = vmul.f32 %v716_v9, %v425_v36 }
 0x112   :  { %v1062_v41 = vpack.c.bf16 %v743_v33, %v742_v1  ;;  %v1102_v42 = vpack.c.bf16 %v759_v34, %v758_v17 }
 0x113   :  { %v1057_v43 = vpack.c.bf16 %v741_v39, %v740_v37  ;;  %v1097_v44 = vpack.c.bf16 %v757_v40, %v756_v38 }
 0x114   :  { %1110 = vst [vmem:[#allocation3 + $0x38] sm:$0xff] %v1062_v41   ;;  %1118 = vst [vmem:[#allocation3 + $0x78] sm:$0xff] %v1102_v42  }
 0x115   :  { %1109 = vst [vmem:[#allocation3 + $0x30] sm:$0xff] %v1057_v43   ;;  %1117 = vst [vmem:[#allocation3 + $0x70] sm:$0xff] %v1097_v44  }
 0x116   :  { %1248 = shalt.err (!%p1245_p4)
}
 0x117   :  { %s1249_s16 = scalar_lea.hbm %s1498_s3, 2048 }
 0x118   :  { %p1250_p5 = scmp.ne.s32.totalorder %s1498_s3, %s1249_s16  ;;  %p1253_p6 = scmp.lt.u32.totalorder %s1249_s16, %s1498_s3 }
 0x11a   :  { %p1255_p7 = pnand %p1253_p6, %p1250_p5 }
 0x11c   :  { %1258 = shalt.err (!%p1255_p7)
}
 0x11d   :  { %s1263_s21 = smov 64   ;;  %s1264_s22 = smov 4  }
 0x11e   :  { %931 = dma.vmem_to_hbm [thread:$0]  %s926_s12, 2048, %s1498_s3, [#allocation4], %s1263_s21, %s1263_s21, %s1264_s22  }
 0x11f   :  { %1259 = dma.done.wait [#allocation4], 2048  }
 0x120   :  { %1260 = vsyncadd [#allocation4], 4294965248 }
 0x121   :  { %935 = vsyncpa [#allocation4], 1 }

</bundles_post_ra>
